<compile_context>
chip_gen: v7x
topology: tpu7x:2x2x1
jax: 0.10.0
libtpu: 0.0.40
codegen_flags: <defaults>
</compile_context>

<pallas_src>
import functools

import jax
import jax.numpy as jnp
from jax import lax
from jax.experimental import pallas as pl
from jax.experimental.pallas import tpu as pltpu


def word_embedding_kernel(S, TS, CH, ids_ref, word_hbm, posseg_ref, gamma_ref,
                          beta_ref, out_ref, gbuf, sems):
    # ids_ref   : SMEM (B*S,) int32          (scalar prefetch)
    # word_hbm  : HBM  (V, H)                (memory_space=pl.ANY, manual DMA)
    # posseg_ref: VMEM (TS, H)  pos[s_block] + seg[0]  (reused across batch steps)
    # gamma/beta: VMEM (1, H)                (resident, constant index_map)
    # out_ref   : VMEM (TS, H)
    # gbuf      : VMEM (TS, H) scratch for gathered word rows
    # sems      : DMA semaphores (TS // CH,)  -- one per row-chunk
    sb = pl.program_id(0)          # seq-block index (outer grid axis)
    b = pl.program_id(1)           # batch index     (inner grid axis)
    base = b * S + sb * TS
    n_chunks = TS // CH
    unroll = True if CH <= 16 else 8

    # ---- Phase 1: issue ALL row gathers up front (per-chunk semaphores) ----
    # Many outstanding DMAs hide the tiny random-row latency.
    for c in range(n_chunks):
        def issue_row(j, carry, c=c):
            row = c * CH + j
            tok = ids_ref[base + row]
            pltpu.make_async_copy(word_hbm.at[tok], gbuf.at[row],
                                  sems.at[c]).start()
            return carry
        lax.fori_loop(0, CH, issue_row, None, unroll=unroll)

    # Hoist gamma/beta loads out of the chunk loop.
    g = gamma_ref[...]
    bt = beta_ref[...]

    # ---- Phase 2: per-chunk aggregate wait -> LayerNorm -> store ----------
    # Later chunks' gathers remain in flight while this chunk is computed.
    for c in range(n_chunks):
        # Aggregate wait: the source slice is shape-only; its byte count equals
        # the sum of the CH single-row copies that signal sems[c].
        pltpu.make_async_copy(word_hbm.at[pl.ds(0, CH)],
                              gbuf.at[pl.ds(c * CH, CH)],
                              sems.at[c]).wait()

        rows = pl.ds(c * CH, CH)
        x = gbuf[rows, :].astype(jnp.float32) + posseg_ref[rows, :]

        # LayerNorm over hidden, eps = 1e-12 (nn.LayerNorm((H,), eps=1e-12)).
        mean = jnp.mean(x, axis=-1, keepdims=True)
        var = jnp.mean(jnp.square(x - mean), axis=-1, keepdims=True)
        xhat = (x - mean) * lax.rsqrt(var + 1e-12)
        out_ref[rows, :] = (xhat * g + bt).astype(out_ref.dtype)
    # TODO(synk): dropout is identity here (inference); training-mode dropout
    # would use pltpu.prng_seed / pltpu.prng_random_bits on each output chunk.
    # TODO(synk): for a bf16/fp8 word table, gather through a uint32-bitcast
    # (V, H/2) view of the table (and a u32 gbuf) to keep the 1-row DMAs on
    # full 32-bit sublanes.


def word_embedding_forward(ids, word_table, pos_table, seg_table, gamma, beta,
                           *, seq_tile=None, row_chunk=64, out_dtype=None):
    B, S = ids.shape
    V, H = word_table.shape
    if out_dtype is None:
        out_dtype = word_table.dtype   # pass jnp.bfloat16 for a bf16 encoder stack

    if seq_tile is None:
        # Bigger tiles amortize per-grid-step overhead; keep TS a divisor of S.
        seq_tile = S
        for cand in (512, 256, 128, 64):
            if S > cand and S % cand == 0:
                seq_tile = cand
                break
    TS = seq_tile
    assert S % TS == 0, "seq_tile must divide seq length"

    CH = min(row_chunk, TS)
    if TS % CH != 0:
        CH = TS
    n_chunks = TS // CH

    # Host-side glue: clamp ids (OOB ids would be an OOB HBM DMA), flatten for
    # SMEM scalar prefetch, fold segment-0 row into the positional table once.
    # NOTE: B*S int32 lives in SMEM; fine for typical BERT shapes, chunk the
    # ids per shard if B*S grows to ~100K+ tokens.
    ids_flat = jnp.clip(ids.reshape(B * S), 0, V - 1).astype(jnp.int32)
    posseg = (pos_table[:S].astype(jnp.float32)
              + seg_table[0].astype(jnp.float32))              # (S, H)
    gamma2 = gamma.reshape(1, H).astype(jnp.float32)
    beta2 = beta.reshape(1, H).astype(jnp.float32)

    kernel = functools.partial(word_embedding_kernel, S, TS, CH)

    out = pl.pallas_call(
        kernel,
        out_shape=jax.ShapeDtypeStruct((B, S, H), out_dtype),
        grid_spec=pltpu.PrefetchScalarGridSpec(
            num_scalar_prefetch=1,
            grid=(S // TS, B),   # seq blocks outer (megacore shard), batch inner
            in_specs=[
                pl.BlockSpec(memory_space=pl.ANY),                  # word table in HBM
                # Depends only on the outer axis -> reused (no re-DMA) across
                # the inner batch steps.
                pl.BlockSpec((TS, H), lambda s, b, ids: (s, 0)),    # pos+seg block
                pl.BlockSpec((1, H), lambda s, b, ids: (0, 0)),     # gamma (resident)
                pl.BlockSpec((1, H), lambda s, b, ids: (0, 0)),     # beta  (resident)
            ],
            out_specs=pl.BlockSpec((None, TS, H),
                                   lambda s, b, ids: (b, s, 0)),
            scratch_shapes=[
                pltpu.VMEM((TS, H), word_table.dtype),
                pltpu.SemaphoreType.DMA((n_chunks,)),
            ],
        ),
        compiler_params=pltpu.CompilerParams(
            dimension_semantics=("parallel", "parallel"),
            # <= 48 MiB: headroom under v7x's 64 MiB physical VMEM, and raised
            # above v5e/v6e's default scoped limit so bigger tiles still
            # double-buffer.
            vmem_limit_bytes=48 * 1024 * 1024,
        ),
    )(ids_flat, word_table, posseg, gamma2, beta2)
    return out


def reference_forward(ids, word_table, pos_table, seg_table, gamma, beta):
    B, S = ids.shape
    w = word_table[ids]                                   # (B, S, H)
    p = pos_table[jnp.arange(S)][None, :, :]              # (1, S, H)
    s = seg_table[jnp.zeros_like(ids)]                    # (B, S, H)
    x = w + s + p
    mean = jnp.mean(x, axis=-1, keepdims=True)
    var = jnp.mean(jnp.square(x - mean), axis=-1, keepdims=True)
    return (x - mean) / jnp.sqrt(var + 1e-12) * gamma + beta


if __name__ == "__main__":
    # Small, deterministic shapes.
    dict_size = 64
    max_sequence_length = 16
    hidden_size = 128
    batch, seq = 2, 8

    key = jax.random.PRNGKey(0)
    k_ids, k_word, k_pos, k_seg = jax.random.split(key, 4)

    ids = jax.random.randint(k_ids, (batch, seq), minval=0, maxval=dict_size,
                             dtype=jnp.int32)
    ids = ids.at[0, 0].set(0)  # exercise padding_idx=0

    word_table = 0.02 * jax.random.normal(k_word, (dict_size, hidden_size),
                                          dtype=jnp.float32)
    word_table = word_table.at[0].set(0.0)                # padding_idx=0 row is zero
    pos_table = 0.02 * jax.random.normal(k_pos, (max_sequence_length, hidden_size),
                                         dtype=jnp.float32)
    seg_table = 0.02 * jax.random.normal(k_seg, (2, hidden_size),
                                         dtype=jnp.float32)
    gamma = jnp.ones((hidden_size,), jnp.float32)          # nn.LayerNorm default init
    beta = jnp.zeros((hidden_size,), jnp.float32)

    out = word_embedding_forward(ids, word_table, pos_table, seg_table, gamma, beta)
    out = jax.block_until_ready(out)

    ref = reference_forward(ids, word_table, pos_table, seg_table, gamma, beta)
    assert out.shape == (batch, seq, hidden_size)
    assert jnp.allclose(out, ref, atol=1e-5, rtol=1e-5), "mismatch vs reference"

    # bf16 output path (what a bf16 encoder stack would consume): math in f32,
    # cast only at the final store -> halved writeback traffic.
    out_bf16 = word_embedding_forward(ids, word_table, pos_table, seg_table,
                                      gamma, beta, out_dtype=jnp.bfloat16)
    out_bf16 = jax.block_until_ready(out_bf16)
    assert out_bf16.dtype == jnp.bfloat16
    assert jnp.allclose(out_bf16.astype(jnp.float32), ref, atol=5e-2, rtol=5e-2), \
        "bf16 output mismatch vs reference"

    print("KERNEL_OK")
</pallas_src>

<mosaic_0001>
module attributes {stable_mosaic.version = 11 : i64} {
  func.func @word_embedding_kernel(%arg0: i32, %arg1: i32, %arg2: memref<16xi32, #tpu.memory_space<smem>>, %arg3: memref<64x128xf32, #tpu.memory_space<any>>, %arg4: memref<8x128xf32, #tpu.memory_space<vmem>>, %arg5: memref<1x128xf32, #tpu.memory_space<vmem>>, %arg6: memref<1x128xf32, #tpu.memory_space<vmem>>, %arg7: memref<1x8x128xf32, #tpu.memory_space<vmem>>, %arg8: memref<8x128xf32, #tpu.memory_space<vmem>>, %arg9: memref<1x!tpu.dma_semaphore, #tpu.memory_space<semaphore_mem>>) attributes {dimension_semantics = [#tpu.dimension_semantics<parallel>, #tpu.dimension_semantics<parallel>], iteration_bounds = array<i64: 1, 2>, scalar_prefetch = 1 : i64, scratch_operands = 2 : i64, tpu.core_type = #tpu.core_type<tc>, window_params = [{}, {transform_indices = @transform_1, window_bounds = array<i64: 8, 128>}, {pipeline_mode = #tpu.pipeline_mode<synchronous>, transform_indices = @transform_2, window_bounds = array<i64: 1, 128>}, {pipeline_mode = #tpu.pipeline_mode<synchronous>, transform_indices = @transform_3, window_bounds = array<i64: 1, 128>}, {transform_indices = @transform_4, window_bounds = array<i64: 1, 8, 128>}]} {
    %c8_i32 = arith.constant 8 : i32
    %0 = arith.muli %arg1, %c8_i32 : i32
    %c8_i32_0 = arith.constant 8 : i32
    %1 = arith.muli %arg0, %c8_i32_0 : i32
    %2 = arith.addi %0, %1 : i32
    %c0_i32 = arith.constant 0 : i32
    %c0_i32_1 = arith.constant 0 : i32
    %3 = arith.addi %c0_i32_1, %c0_i32 : i32
    %4 = arith.addi %2, %3 : i32
    %5 = arith.index_cast %4 : i32 to index
    %6 = memref.load %arg2[%5] : memref<16xi32, #tpu.memory_space<smem>>
    %c0_i32_2 = arith.constant 0 : i32
    %c0_i32_3 = arith.constant 0 : i32
    %7 = tpu.memref_slice %arg3[%6, %c0_i32_3] : memref<64x128xf32, #tpu.memory_space<any>> -> memref<1x128xf32, #tpu.memory_space<any>>
    %8 = tpu.memref_squeeze %7 : memref<1x128xf32, #tpu.memory_space<any>> -> memref<128xf32, #tpu.memory_space<any>>
    %c0_i32_4 = arith.constant 0 : i32
    %9 = tpu.memref_slice %arg8[%3, %c0_i32_4] : memref<8x128xf32, #tpu.memory_space<vmem>> -> memref<1x128xf32, #tpu.memory_space<vmem>>
    %10 = tpu.memref_squeeze %9 : memref<1x128xf32, #tpu.memory_space<vmem>> -> memref<128xf32, #tpu.memory_space<vmem>>
    %11 = tpu.memref_slice %arg9[%c0_i32_2] : memref<1x!tpu.dma_semaphore, #tpu.memory_space<semaphore_mem>> -> memref<1x!tpu.dma_semaphore, #tpu.memory_space<semaphore_mem>>
    %12 = tpu.memref_squeeze %11 : memref<1x!tpu.dma_semaphore, #tpu.memory_space<semaphore_mem>> -> memref<!tpu.dma_semaphore, #tpu.memory_space<semaphore_mem>>
    tpu.enqueue_dma source(%8 : memref<128xf32, #tpu.memory_space<any>>) target(%10 : memref<128xf32, #tpu.memory_space<vmem>>) target_semaphore(%12 : memref<!tpu.dma_semaphore, #tpu.memory_space<semaphore_mem>>)
    %c1_i32 = arith.constant 1 : i32
    %c0_i32_5 = arith.constant 0 : i32
    %13 = arith.addi %c0_i32_5, %c1_i32 : i32
    %14 = arith.addi %2, %13 : i32
    %15 = arith.index_cast %14 : i32 to index
    %16 = memref.load %arg2[%15] : memref<16xi32, #tpu.memory_space<smem>>
    %c0_i32_6 = arith.constant 0 : i32
    %c0_i32_7 = arith.constant 0 : i32
    %17 = tpu.memref_slice %arg3[%16, %c0_i32_7] : memref<64x128xf32, #tpu.memory_space<any>> -> memref<1x128xf32, #tpu.memory_space<any>>
    %18 = tpu.memref_squeeze %17 : memref<1x128xf32, #tpu.memory_space<any>> -> memref<128xf32, #tpu.memory_space<any>>
    %c0_i32_8 = arith.constant 0 : i32
    %19 = tpu.memref_slice %arg8[%13, %c0_i32_8] : memref<8x128xf32, #tpu.memory_space<vmem>> -> memref<1x128xf32, #tpu.memory_space<vmem>>
    %20 = tpu.memref_squeeze %19 : memref<1x128xf32, #tpu.memory_space<vmem>> -> memref<128xf32, #tpu.memory_space<vmem>>
    %21 = tpu.memref_slice %arg9[%c0_i32_6] : memref<1x!tpu.dma_semaphore, #tpu.memory_space<semaphore_mem>> -> memref<1x!tpu.dma_semaphore, #tpu.memory_space<semaphore_mem>>
    %22 = tpu.memref_squeeze %21 : memref<1x!tpu.dma_semaphore, #tpu.memory_space<semaphore_mem>> -> memref<!tpu.dma_semaphore, #tpu.memory_space<semaphore_mem>>
    tpu.enqueue_dma source(%18 : memref<128xf32, #tpu.memory_space<any>>) target(%20 : memref<128xf32, #tpu.memory_space<vmem>>) target_semaphore(%22 : memref<!tpu.dma_semaphore, #tpu.memory_space<semaphore_mem>>)
    %c2_i32 = arith.constant 2 : i32
    %c0_i32_9 = arith.constant 0 : i32
    %23 = arith.addi %c0_i32_9, %c2_i32 : i32
    %24 = arith.addi %2, %23 : i32
    %25 = arith.index_cast %24 : i32 to index
    %26 = memref.load %arg2[%25] : memref<16xi32, #tpu.memory_space<smem>>
    %c0_i32_10 = arith.constant 0 : i32
    %c0_i32_11 = arith.constant 0 : i32
    %27 = tpu.memref_slice %arg3[%26, %c0_i32_11] : memref<64x128xf32, #tpu.memory_space<any>> -> memref<1x128xf32, #tpu.memory_space<any>>
    %28 = tpu.memref_squeeze %27 : memref<1x128xf32, #tpu.memory_space<any>> -> memref<128xf32, #tpu.memory_space<any>>
    %c0_i32_12 = arith.constant 0 : i32
    %29 = tpu.memref_slice %arg8[%23, %c0_i32_12] : memref<8x128xf32, #tpu.memory_space<vmem>> -> memref<1x128xf32, #tpu.memory_space<vmem>>
    %30 = tpu.memref_squeeze %29 : memref<1x128xf32, #tpu.memory_space<vmem>> -> memref<128xf32, #tpu.memory_space<vmem>>
    %31 = tpu.memref_slice %arg9[%c0_i32_10] : memref<1x!tpu.dma_semaphore, #tpu.memory_space<semaphore_mem>> -> memref<1x!tpu.dma_semaphore, #tpu.memory_space<semaphore_mem>>
    %32 = tpu.memref_squeeze %31 : memref<1x!tpu.dma_semaphore, #tpu.memory_space<semaphore_mem>> -> memref<!tpu.dma_semaphore, #tpu.memory_space<semaphore_mem>>
    tpu.enqueue_dma source(%28 : memref<128xf32, #tpu.memory_space<any>>) target(%30 : memref<128xf32, #tpu.memory_space<vmem>>) target_semaphore(%32 : memref<!tpu.dma_semaphore, #tpu.memory_space<semaphore_mem>>)
    %c3_i32 = arith.constant 3 : i32
    %c0_i32_13 = arith.constant 0 : i32
    %33 = arith.addi %c0_i32_13, %c3_i32 : i32
    %34 = arith.addi %2, %33 : i32
    %35 = arith.index_cast %34 : i32 to index
    %36 = memref.load %arg2[%35] : memref<16xi32, #tpu.memory_space<smem>>
    %c0_i32_14 = arith.constant 0 : i32
    %c0_i32_15 = arith.constant 0 : i32
    %37 = tpu.memref_slice %arg3[%36, %c0_i32_15] : memref<64x128xf32, #tpu.memory_space<any>> -> memref<1x128xf32, #tpu.memory_space<any>>
    %38 = tpu.memref_squeeze %37 : memref<1x128xf32, #tpu.memory_space<any>> -> memref<128xf32, #tpu.memory_space<any>>
    %c0_i32_16 = arith.constant 0 : i32
    %39 = tpu.memref_slice %arg8[%33, %c0_i32_16] : memref<8x128xf32, #tpu.memory_space<vmem>> -> memref<1x128xf32, #tpu.memory_space<vmem>>
    %40 = tpu.memref_squeeze %39 : memref<1x128xf32, #tpu.memory_space<vmem>> -> memref<128xf32, #tpu.memory_space<vmem>>
    %41 = tpu.memref_slice %arg9[%c0_i32_14] : memref<1x!tpu.dma_semaphore, #tpu.memory_space<semaphore_mem>> -> memref<1x!tpu.dma_semaphore, #tpu.memory_space<semaphore_mem>>
    %42 = tpu.memref_squeeze %41 : memref<1x!tpu.dma_semaphore, #tpu.memory_space<semaphore_mem>> -> memref<!tpu.dma_semaphore, #tpu.memory_space<semaphore_mem>>
    tpu.enqueue_dma source(%38 : memref<128xf32, #tpu.memory_space<any>>) target(%40 : memref<128xf32, #tpu.memory_space<vmem>>) target_semaphore(%42 : memref<!tpu.dma_semaphore, #tpu.memory_space<semaphore_mem>>)
    %c4_i32 = arith.constant 4 : i32
    %c0_i32_17 = arith.constant 0 : i32
    %43 = arith.addi %c0_i32_17, %c4_i32 : i32
    %44 = arith.addi %2, %43 : i32
    %45 = arith.index_cast %44 : i32 to index
    %46 = memref.load %arg2[%45] : memref<16xi32, #tpu.memory_space<smem>>
    %c0_i32_18 = arith.constant 0 : i32
    %c0_i32_19 = arith.constant 0 : i32
    %47 = tpu.memref_slice %arg3[%46, %c0_i32_19] : memref<64x128xf32, #tpu.memory_space<any>> -> memref<1x128xf32, #tpu.memory_space<any>>
    %48 = tpu.memref_squeeze %47 : memref<1x128xf32, #tpu.memory_space<any>> -> memref<128xf32, #tpu.memory_space<any>>
    %c0_i32_20 = arith.constant 0 : i32
    %49 = tpu.memref_slice %arg8[%43, %c0_i32_20] : memref<8x128xf32, #tpu.memory_space<vmem>> -> memref<1x128xf32, #tpu.memory_space<vmem>>
    %50 = tpu.memref_squeeze %49 : memref<1x128xf32, #tpu.memory_space<vmem>> -> memref<128xf32, #tpu.memory_space<vmem>>
    %51 = tpu.memref_slice %arg9[%c0_i32_18] : memref<1x!tpu.dma_semaphore, #tpu.memory_space<semaphore_mem>> -> memref<1x!tpu.dma_semaphore, #tpu.memory_space<semaphore_mem>>
    %52 = tpu.memref_squeeze %51 : memref<1x!tpu.dma_semaphore, #tpu.memory_space<semaphore_mem>> -> memref<!tpu.dma_semaphore, #tpu.memory_space<semaphore_mem>>
    tpu.enqueue_dma source(%48 : memref<128xf32, #tpu.memory_space<any>>) target(%50 : memref<128xf32, #tpu.memory_space<vmem>>) target_semaphore(%52 : memref<!tpu.dma_semaphore, #tpu.memory_space<semaphore_mem>>)
    %c5_i32 = arith.constant 5 : i32
    %c0_i32_21 = arith.constant 0 : i32
    %53 = arith.addi %c0_i32_21, %c5_i32 : i32
    %54 = arith.addi %2, %53 : i32
    %55 = arith.index_cast %54 : i32 to index
    %56 = memref.load %arg2[%55] : memref<16xi32, #tpu.memory_space<smem>>
    %c0_i32_22 = arith.constant 0 : i32
    %c0_i32_23 = arith.constant 0 : i32
    %57 = tpu.memref_slice %arg3[%56, %c0_i32_23] : memref<64x128xf32, #tpu.memory_space<any>> -> memref<1x128xf32, #tpu.memory_space<any>>
    %58 = tpu.memref_squeeze %57 : memref<1x128xf32, #tpu.memory_space<any>> -> memref<128xf32, #tpu.memory_space<any>>
    %c0_i32_24 = arith.constant 0 : i32
    %59 = tpu.memref_slice %arg8[%53, %c0_i32_24] : memref<8x128xf32, #tpu.memory_space<vmem>> -> memref<1x128xf32, #tpu.memory_space<vmem>>
    %60 = tpu.memref_squeeze %59 : memref<1x128xf32, #tpu.memory_space<vmem>> -> memref<128xf32, #tpu.memory_space<vmem>>
    %61 = tpu.memref_slice %arg9[%c0_i32_22] : memref<1x!tpu.dma_semaphore, #tpu.memory_space<semaphore_mem>> -> memref<1x!tpu.dma_semaphore, #tpu.memory_space<semaphore_mem>>
    %62 = tpu.memref_squeeze %61 : memref<1x!tpu.dma_semaphore, #tpu.memory_space<semaphore_mem>> -> memref<!tpu.dma_semaphore, #tpu.memory_space<semaphore_mem>>
    tpu.enqueue_dma source(%58 : memref<128xf32, #tpu.memory_space<any>>) target(%60 : memref<128xf32, #tpu.memory_space<vmem>>) target_semaphore(%62 : memref<!tpu.dma_semaphore, #tpu.memory_space<semaphore_mem>>)
    %c6_i32 = arith.constant 6 : i32
    %c0_i32_25 = arith.constant 0 : i32
    %63 = arith.addi %c0_i32_25, %c6_i32 : i32
    %64 = arith.addi %2, %63 : i32
    %65 = arith.index_cast %64 : i32 to index
    %66 = memref.load %arg2[%65] : memref<16xi32, #tpu.memory_space<smem>>
    %c0_i32_26 = arith.constant 0 : i32
    %c0_i32_27 = arith.constant 0 : i32
    %67 = tpu.memref_slice %arg3[%66, %c0_i32_27] : memref<64x128xf32, #tpu.memory_space<any>> -> memref<1x128xf32, #tpu.memory_space<any>>
    %68 = tpu.memref_squeeze %67 : memref<1x128xf32, #tpu.memory_space<any>> -> memref<128xf32, #tpu.memory_space<any>>
    %c0_i32_28 = arith.constant 0 : i32
    %69 = tpu.memref_slice %arg8[%63, %c0_i32_28] : memref<8x128xf32, #tpu.memory_space<vmem>> -> memref<1x128xf32, #tpu.memory_space<vmem>>
    %70 = tpu.memref_squeeze %69 : memref<1x128xf32, #tpu.memory_space<vmem>> -> memref<128xf32, #tpu.memory_space<vmem>>
    %71 = tpu.memref_slice %arg9[%c0_i32_26] : memref<1x!tpu.dma_semaphore, #tpu.memory_space<semaphore_mem>> -> memref<1x!tpu.dma_semaphore, #tpu.memory_space<semaphore_mem>>
    %72 = tpu.memref_squeeze %71 : memref<1x!tpu.dma_semaphore, #tpu.memory_space<semaphore_mem>> -> memref<!tpu.dma_semaphore, #tpu.memory_space<semaphore_mem>>
    tpu.enqueue_dma source(%68 : memref<128xf32, #tpu.memory_space<any>>) target(%70 : memref<128xf32, #tpu.memory_space<vmem>>) target_semaphore(%72 : memref<!tpu.dma_semaphore, #tpu.memory_space<semaphore_mem>>)
    %c7_i32 = arith.constant 7 : i32
    %c0_i32_29 = arith.constant 0 : i32
    %73 = arith.addi %c0_i32_29, %c7_i32 : i32
    %74 = arith.addi %2, %73 : i32
    %75 = arith.index_cast %74 : i32 to index
    %76 = memref.load %arg2[%75] : memref<16xi32, #tpu.memory_space<smem>>
    %c0_i32_30 = arith.constant 0 : i32
    %c0_i32_31 = arith.constant 0 : i32
    %77 = tpu.memref_slice %arg3[%76, %c0_i32_31] : memref<64x128xf32, #tpu.memory_space<any>> -> memref<1x128xf32, #tpu.memory_space<any>>
    %78 = tpu.memref_squeeze %77 : memref<1x128xf32, #tpu.memory_space<any>> -> memref<128xf32, #tpu.memory_space<any>>
    %c0_i32_32 = arith.constant 0 : i32
    %79 = tpu.memref_slice %arg8[%73, %c0_i32_32] : memref<8x128xf32, #tpu.memory_space<vmem>> -> memref<1x128xf32, #tpu.memory_space<vmem>>
    %80 = tpu.memref_squeeze %79 : memref<1x128xf32, #tpu.memory_space<vmem>> -> memref<128xf32, #tpu.memory_space<vmem>>
    %81 = tpu.memref_slice %arg9[%c0_i32_30] : memref<1x!tpu.dma_semaphore, #tpu.memory_space<semaphore_mem>> -> memref<1x!tpu.dma_semaphore, #tpu.memory_space<semaphore_mem>>
    %82 = tpu.memref_squeeze %81 : memref<1x!tpu.dma_semaphore, #tpu.memory_space<semaphore_mem>> -> memref<!tpu.dma_semaphore, #tpu.memory_space<semaphore_mem>>
    tpu.enqueue_dma source(%78 : memref<128xf32, #tpu.memory_space<any>>) target(%80 : memref<128xf32, #tpu.memory_space<vmem>>) target_semaphore(%82 : memref<!tpu.dma_semaphore, #tpu.memory_space<semaphore_mem>>)
    %c8_i32_33 = arith.constant 8 : i32
    %c0 = arith.constant 0 : index
    %c0_34 = arith.constant 0 : index
    %83 = vector.load %arg5[%c0, %c0_34] : memref<1x128xf32, #tpu.memory_space<vmem>>, vector<1x128xf32>
    %c0_35 = arith.constant 0 : index
    %c0_36 = arith.constant 0 : index
    %84 = vector.load %arg6[%c0_35, %c0_36] : memref<1x128xf32, #tpu.memory_space<vmem>>, vector<1x128xf32>
    %c0_i32_37 = arith.constant 0 : i32
    %c0_i32_38 = arith.constant 0 : i32
    %c0_i32_39 = arith.constant 0 : i32
    %85 = tpu.memref_slice %arg3[%c0_i32_38, %c0_i32_39] : memref<64x128xf32, #tpu.memory_space<any>> -> memref<8x128xf32, #tpu.memory_space<any>>
    %c0_i32_40 = arith.constant 0 : i32
    %c0_i32_41 = arith.constant 0 : i32
    %86 = tpu.memref_slice %arg8[%c0_i32_40, %c0_i32_41] : memref<8x128xf32, #tpu.memory_space<vmem>> -> memref<8x128xf32, #tpu.memory_space<vmem>>
    %87 = tpu.memref_slice %arg9[%c0_i32_37] : memref<1x!tpu.dma_semaphore, #tpu.memory_space<semaphore_mem>> -> memref<1x!tpu.dma_semaphore, #tpu.memory_space<semaphore_mem>>
    %88 = tpu.memref_squeeze %87 : memref<1x!tpu.dma_semaphore, #tpu.memory_space<semaphore_mem>> -> memref<!tpu.dma_semaphore, #tpu.memory_space<semaphore_mem>>
    tpu.wait_dma2 semaphore(%88 : memref<!tpu.dma_semaphore, #tpu.memory_space<semaphore_mem>>) src(%85 : memref<8x128xf32, #tpu.memory_space<any>>) dst(%86 : memref<8x128xf32, #tpu.memory_space<vmem>>)
    %c0_42 = arith.constant 0 : index
    %c0_43 = arith.constant 0 : index
    %89 = vector.load %arg8[%c0_42, %c0_43] : memref<8x128xf32, #tpu.memory_space<vmem>>, vector<8x128xf32>
    %c0_44 = arith.constant 0 : index
    %c0_45 = arith.constant 0 : index
    %90 = vector.load %arg4[%c0_44, %c0_45] : memref<8x128xf32, #tpu.memory_space<vmem>>, vector<8x128xf32>
    %91 = arith.addf %89, %90 : vector<8x128xf32>
    %cst = arith.constant dense<0.000000e+00> : vector<8xf32>
    %92 = vector.multi_reduction <add>, %91, %cst [1] : vector<8x128xf32> to vector<8xf32>
    %93 = vector.shape_cast %92 : vector<8xf32> to vector<8x1xf32>
    %cst_46 = arith.constant 1.280000e+02 : f32
    %94 = vector.broadcast %cst_46 : f32 to vector<8x1xf32>
    %95 = arith.divf %93, %94 : vector<8x1xf32>
    %96 = vector.broadcast %95 : vector<8x1xf32> to vector<8x128xf32>
    %97 = arith.subf %91, %96 : vector<8x128xf32>
    %98 = arith.mulf %97, %97 : vector<8x128xf32>
    %cst_47 = arith.constant dense<0.000000e+00> : vector<8xf32>
    %99 = vector.multi_reduction <add>, %98, %cst_47 [1] : vector<8x128xf32> to vector<8xf32>
    %100 = vector.shape_cast %99 : vector<8xf32> to vector<8x1xf32>
    %cst_48 = arith.constant 1.280000e+02 : f32
    %101 = vector.broadcast %cst_48 : f32 to vector<8x1xf32>
    %102 = arith.divf %100, %101 : vector<8x1xf32>
    %103 = vector.broadcast %95 : vector<8x1xf32> to vector<8x128xf32>
    %104 = arith.subf %91, %103 : vector<8x128xf32>
    %cst_49 = arith.constant 9.99999996E-13 : f32
    %105 = vector.broadcast %cst_49 : f32 to vector<8x1xf32>
    %106 = arith.addf %102, %105 : vector<8x1xf32>
    %107 = math.rsqrt %106 : vector<8x1xf32>
    %108 = vector.broadcast %107 : vector<8x1xf32> to vector<8x128xf32>
    %109 = arith.mulf %104, %108 : vector<8x128xf32>
    %110 = vector.broadcast %83 : vector<1x128xf32> to vector<8x128xf32>
    %111 = arith.mulf %109, %110 : vector<8x128xf32>
    %112 = vector.broadcast %84 : vector<1x128xf32> to vector<8x128xf32>
    %113 = arith.addf %111, %112 : vector<8x128xf32>
    %c0_50 = arith.constant 0 : index
    %c0_51 = arith.constant 0 : index
    %c0_52 = arith.constant 0 : index
    %114 = vector.load %arg7[%c0_50, %c0_51, %c0_52] : memref<1x8x128xf32, #tpu.memory_space<vmem>>, vector<1x8x128xf32>
    %115 = vector.shape_cast %114 : vector<1x8x128xf32> to vector<8x128xf32>
    %116 = vector.shape_cast %113 : vector<8x128xf32> to vector<1x8x128xf32>
    tpu.vector_store %arg7[%c0_50, %c0_51, %c0_52], %116 {strides = array<i32>} : memref<1x8x128xf32, #tpu.memory_space<vmem>>, vector<1x8x128xf32>,
    return
  }
  func.func @transform_1(%arg0: i32, %arg1: i32, %arg2: memref<16xi32, #tpu.memory_space<smem>>) -> (i32, i32) {
    %c0_i32 = arith.constant 0 : i32
    %c0_i32_0 = arith.constant 0 : i32
    return %arg0, %c0_i32 : i32, i32
  }
  func.func @transform_2(%arg0: i32, %arg1: i32, %arg2: memref<16xi32, #tpu.memory_space<smem>>) -> (i32, i32) {
    %c0_i32 = arith.constant 0 : i32
    %c0_i32_0 = arith.constant 0 : i32
    %c0_i32_1 = arith.constant 0 : i32
    return %c0_i32, %c0_i32_0 : i32, i32
  }
  func.func @transform_3(%arg0: i32, %arg1: i32, %arg2: memref<16xi32, #tpu.memory_space<smem>>) -> (i32, i32) {
    %c0_i32 = arith.constant 0 : i32
    %c0_i32_0 = arith.constant 0 : i32
    %c0_i32_1 = arith.constant 0 : i32
    return %c0_i32, %c0_i32_0 : i32, i32
  }
  func.func @transform_4(%arg0: i32, %arg1: i32, %arg2: memref<16xi32, #tpu.memory_space<smem>>) -> (i32, i32, i32) {
    %c0_i32 = arith.constant 0 : i32
    %c0_i32_0 = arith.constant 0 : i32
    return %arg1, %arg0, %c0_i32 : i32, i32, i32
  }
}

</mosaic_0001>

<bundles_post_ra>
// kernel: tpu_custom_call.1
= control target key start
LH: loop header
LB: loop body
LE: loop exit
PB: predicated region body
PF: predicated region fallthrough
CT: control target
= control target key end

     0   :  { %s1222_s0 = inlined_call_operand.hbm [shape: s32[16], index: 0, kind: input, shape index: {}]   ;;  %s1223_s1 = inlined_call_operand.hbm [shape: f32[64,128], index: 1, kind: input, shape index: {}]   ;;  %s1224_s2 = inlined_call_operand.hbm [shape: f32[8,128], index: 2, kind: input, shape index: {}]   ;;  %s1225_s3 = inlined_call_operand.vmem [shape: f32[1,128], index: 3, kind: input, shape index: {}]   ;;  %s1226_s4 = inlined_call_operand.vmem [shape: f32[1,128], index: 4, kind: input, shape index: {}]   ;;  %s1227_s5 = inlined_call_operand.hbm [shape: f32[2,8,128], index: 5, kind: output, shape index: {}]  }
   0x1   :  { %1235 = sst [smem:[#allocation34_spill]] %s1224_s2  ;;  %s560_s20 = scalar_lea.hbm %s1222_s0, 16 }
   0x2   :  { %1236 = sst [smem:[#allocation35_spill]] %s1225_s3  ;;  %p561_p0 = scmp.ne.s32.totalorder %s1222_s0, %s560_s20 }
   0x3   :  { %1237 = sst [smem:[#allocation36_spill]] %s1226_s4  ;;  %p564_p1 = scmp.lt.u32.totalorder %s560_s20, %s1222_s0 }
   0x5   :  { %p566_p2 = pnand %p564_p1, %p561_p0 }
   0x7   :  { %569 = shalt.err (!%p566_p2)  }
   0x8   :  { %s878_s25 = smov [#allocation5]  }
   0x9   :  { %11 = dma.hbm_to_smem %s1222_s0, 16, %s878_s25, [#allocation4] }
   0xa   :  { %842 = dma.done.wait [#allocation4], 16 }
   0xb   :  { %843 = vsyncadd [#allocation4], 4294967280 }
   0xc   :  { %13 = sfence }
   0xd   :  { %14 = vsyncpa [#allocation7], 0 }
   0xe   :  { %15 = vsyncpa [#allocation8], 0 }
   0xf   :  { %17 = vsyncpa [#allocation8 + $0x1], 0  ;;  %s931_s28 = smov 0   ;;  %s933_s29 = smov 0  }
  0x10   :  { %s935_s30 = smov 0   ;;  %s937_s6 = smov 0  }
  0x11   :  { %s939_s7 = smov 0   ;;  %s941_s8 = smov 0  }
  0x12 LB: > { %1238 = sst [smem:[#allocation32_spill]] %s872_s7  ;;  %s460_s0 = sadd.s32 4294967295, %s876_s8   ;;  %s876_s8 = sphi %s941_s8, %s23_s8   ;;  %s872_s7 = sphi %s939_s7, %s1254_s7   ;;  %s868_s6 = sphi %s937_s6, %s1253_s6   ;;  %s864_s30 = sphi %s935_s30, %s1257_s30   ;;  %s860_s29 = sphi %s933_s29, %s1256_s29   ;;  %s856_s28 = sphi %s931_s28, %s1255_s28  }
  0x13   : > { %s461_s9 = sadd.s32 4294967294, %s876_s8   ;;  %s32_s10 = sadd.s32 1, %s872_s7 }
  0x14   : > { %s112_s11 = sadd.s32 1, %s864_s30  ;;  %p33_p3 = scmp.ge.s32.totalorder %s32_s10, 2 }
  0x15   : > { %p122_p4 = scmp.ne.s32.totalorder %s864_s30, %s860_s29  ;;  %p123_p5 = scmp.eq.s32.totalorder %s460_s0, 1 }
  0x16   : > { %p128_p6 = scmp.ne.s32.totalorder %s860_s29, %s856_s28  ;;  %s1259_s10 = smov (%p33_p3, %s32_s10), 0 }
  0x17   : > { %1239 = sst [smem:[#allocation33_spill]] %s1259_s10  ;;  %p971_p7 = por %p123_p5, %p122_p4 }
  0x18   : > { %p129_p8 = scmp.eq.s32.totalorder %s461_s9, 1  ;;  %s107_s13 = ssub.s32 %s872_s7, %s1259_s10 }
  0x19   : > { %s1240_s12 = scalar_select %p971_p7, 1, 0 }
  0x1a   : > { %p462_p9 = scmp.ge.s32.totalorder %s876_s8, 1  ;;  %p110_p10 = scmp.eq.s32.totalorder %s107_s13, 0 }
  0x1b   : > { %p978_p11 = por %p129_p8, %p128_p6  ;;  %p136_p12 = scmp.lt.s32.totalorder %s876_s8, 3 }
  0x1c   : > { %s984_s15 = scalar_select %p110_p10, %s864_s30, %s112_s11  }
  0x1d   : > { %s1241_s14 = scalar_select %p978_p11, 1, 0 }
  0x1e   : > { %p986_p13 = pnand %p462_p9, %p136_p12  ;;  %p990_p0 = scmp.eq.s32.totalorder %s460_s0, 0 }
  0x1f   : > { %s879_s18 = smov [#allocation6]   ;;  %s1245_s2 = sld [smem:[#allocation34_spill]] }
  0x20   : > { %s1242_s16 = scalar_select %p986_p13, 1, 0 }
  0x21   : > { %s1243_s17 = scalar_select %p990_p0, 1, 0 }
  0x22   : > { %p489_p1 = pneg %p986_p13  ;;  %s151_s19 = sshll.u32 %s879_s18, 4  ;;  %s152_s19 = int_to_ptr.vmem [resolvable:$true] %s151_s19 }
  0x24   : > { %p998_p2 = pnand %p990_p0, %p489_p1 }
  0x25   : > { %s570_s23 = scalar_lea.hbm %s1245_s2, 128 }
  0x26   : > { %p571_p3 = scmp.ne.s32.totalorder %s1245_s2, %s570_s23  ;;  %p572_p4 = pneg %p998_p2 }
  0x27   : > { %p577_p8 = scmp.lt.u32.totalorder %s570_s23, %s1245_s2 }
  0x28   : > { %p573_p5 = pnand %p572_p4, %p571_p3 }
  0x2a   : > { %p574_p6 = pneg %p573_p5 }
  0x2c   : > { %p579_p9 = pnand %p577_p8, %p574_p6 }
  0x2e   : > { %582 = shalt.err (!%p579_p9)
}
  0x2f   : > { %s583_s0 = scalar_lea.vmem %s152_s19, 128  ;;  %p591_p11 = scmp.lt.s32.totalorder %s152_s19, %s152_s19 }
  0x30   : > { %p584_p10 = scmp.ne.s32.totalorder %s152_s19, %s583_s0  ;;  %p592_p7 = scmp.lt.s32.totalorder %s583_s0, %s583_s0 }
  0x32   : > { %p586_p12 = pnand %p584_p10, %p572_p4  ;;  %p593_p0 = por %p592_p7, %p591_p11 }
  0x34   : > { %p587_p1 = pneg %p586_p12 }
  0x36   : > { %p594_p13 = pnand %p593_p0, %p587_p1 }
  0x38   : > { %597 = shalt.err (!%p594_p13)
}
  0x39   : > { %492 = dma.hbm_to_vmem [thread:$0]  (!%p998_p2), %s1245_s2, 128, %s152_s19, [#allocation7]  }
  0x3a   : > { %p1246_p3 = scmp.ne.s32.totalorder %s1242_s16, 0 }
  0x3b   : > { %p1247_p5 = scmp.ne.s32.totalorder (!%p1246_p3), %s1243_s17, 0 }
  0x3c   : > { %170 = sbr.rel (%p1246_p3) target bundleno = 579 (0x243), region = 32 }
  0x43   : > { %845 = dma.done.wait (%p1247_p5), [#allocation7], 128  }
  0x44   : > { %847 = vsyncadd (%p1247_p5), [#allocation7], 4294967168  ;;  %s1232_s13 = sand.u32 1, %s860_s29   ;;  %s1026_s18 = sshll.u32 %s868_s6, 3 }
  0x45   : > { %s1030_s19 = sshll.u32 %s1232_s13, 3  ;;  %s192_s16 = sld [smem:[#allocation5 + %s1026_s18]] }
  0x46   : > { %s880_s20 = smov [#allocation2]   ;;  %s206_s22 = sadd.s32 1, %s1026_s18 }
  0x47   : > { %s202_s21 = sshll.u32 %s880_s20, 4  ;;  %s1036_s17 = sld [smem:[#allocation5 + %s206_s22]]  ;;  %s1034_s21 = int_to_ptr.vmem [resolvable:$true] %s202_s21 }
  0x48   : > { %s222_s23 = sadd.s32 2, %s1026_s18  ;;  %s881_s24 = smov [#allocation2 + $0x1]  }
  0x49   : > { %s218_s25 = sshll.u32 %s881_s24, 4  ;;  %s1039_s26 = sld [smem:[#allocation5 + %s222_s23]]  ;;  %s1051_s25 = int_to_ptr.vmem [resolvable:$true] %s218_s25 }
  0x4a   : > { %s1248_s3 = sld [smem:[#allocation35_spill]]  ;;  %s1249_s4 = sld [smem:[#allocation36_spill]] }
  0x4b   : > { %s468_s20 = sshll.u32 %s192_s16, 4  ;;  %s1059_s27 = scalar_lea.hbm %s1223_s1, 1024 }
  0x4c   : > { %s194_s2 = scalar_lea.hbm %s1223_s1, %s468_s20 }
  0x4d   : > { %s598_s24 = scalar_lea.hbm %s194_s2, 16  ;;  %p601_p11 = scmp.lt.u32.totalorder %s194_s2, %s1223_s1 }
  0x4e   : > { %p599_p7 = scmp.ne.s32.totalorder %s194_s2, %s598_s24  ;;  %p602_p13 = scmp.lt.u32.totalorder %s1059_s27, %s598_s24 }
  0x4f   : > { %p604_p2 = scmp.lt.u32.totalorder %s598_s24, %s194_s2 }
  0x50   : > { %v1044_v0 = vld [vmem:[%s1248_s3] ss:$0 sm:$0xff]  ;;  %p603_p0 = por %p602_p13, %p601_p11 }
  0x51   : > { %v1049_v1 = vld [vmem:[%s1249_s4] ss:$0 sm:$0xff] }
  0x52   : > { %p605_p4 = por %p604_p2, %p603_p0 }
  0x54   : > { %p606_p6 = pnand %p605_p4, %p599_p7 }
  0x56   : > { %609 = shalt.err (!%p606_p6)  }
  0x57   : > { %s610_s13 = scalar_lea.vmem %s1034_s21, 16  ;;  %s1068_s10 = scalar_lea.vmem %s1034_s21, 128 }
  0x58   : > { %p611_p8 = scmp.ne.s32.totalorder %s1034_s21, %s610_s13  ;;  %p615_p9 = scmp.lt.s32.totalorder %s1034_s21, %s1034_s21 }
  0x59   : > { %p616_p10 = scmp.lt.s32.totalorder %s1068_s10, %s610_s13 }
  0x5b   : > { %p617_p12 = por %p616_p10, %p615_p9 }
  0x5d   : > { %p618_p1 = pnand %p617_p12, %p611_p8 }
  0x5f   : > { %621 = shalt.err (!%p618_p1)  }
  0x60   : > { %205 = dma.hbm_to_vmem [thread:$0]  %s194_s2, 16, %s1034_s21, [#allocation3] }
  0x61   : > { %s469_s3 = sshll.u32 %s1036_s17, 4  ;;  %s882_s16 = smov [#allocation2 + $0x2]  }
  0x62   : > { %s234_s9 = sshll.u32 %s882_s16, 4  ;;  %s209_s22 = scalar_lea.hbm %s1223_s1, %s469_s3  ;;  %s1078_s9 = int_to_ptr.vmem [resolvable:$true] %s234_s9 }
  0x63   : > { %s622_s24 = scalar_lea.hbm %s209_s22, 16  ;;  %p625_p5 = scmp.lt.u32.totalorder %s209_s22, %s1223_s1 }
  0x64   : > { %p623_p3 = scmp.ne.s32.totalorder %s209_s22, %s622_s24  ;;  %p626_p7 = scmp.lt.u32.totalorder %s1059_s27, %s622_s24 }
  0x65   : > { %p628_p13 = scmp.lt.u32.totalorder %s622_s24, %s209_s22 }
  0x66   : > { %p627_p11 = por %p626_p7, %p625_p5 }
  0x68   : > { %p629_p0 = por %p628_p13, %p627_p11 }
  0x6a   : > { %p630_p2 = pnand %p629_p0, %p623_p3 }
  0x6c   : > { %633 = shalt.err (!%p630_p2)  }
  0x6d   : > { %s634_s2 = scalar_lea.vmem %s1051_s25, 16  ;;  %p639_p6 = scmp.lt.s32.totalorder %s1051_s25, %s1034_s21 }
  0x6e   : > { %p635_p4 = scmp.ne.s32.totalorder %s1051_s25, %s634_s2  ;;  %p640_p8 = scmp.lt.s32.totalorder %s1068_s10, %s634_s2 }
  0x70   : > { %p641_p9 = por %p640_p8, %p639_p6 }
  0x72   : > { %p642_p10 = pnand %p641_p9, %p635_p4 }
  0x74   : > { %645 = shalt.err (!%p642_p10)  }
  0x75   : > { %221 = dma.hbm_to_vmem [thread:$0]  %s209_s22, 16, %s1051_s25, [#allocation3] }
  0x76   : > { %s470_s17 = sshll.u32 %s1039_s26, 4  ;;  %s238_s13 = sadd.s32 3, %s1026_s18 }
  0x77   : > { %s225_s11 = scalar_lea.hbm %s1223_s1, %s470_s17  ;;  %s1095_s20 = sld [smem:[#allocation5 + %s238_s13]] }
  0x78   : > { %s646_s24 = scalar_lea.hbm %s225_s11, 16  ;;  %p649_p1 = scmp.lt.u32.totalorder %s225_s11, %s1223_s1 }
  0x79   : > { %p647_p12 = scmp.ne.s32.totalorder %s225_s11, %s646_s24  ;;  %p650_p3 = scmp.lt.u32.totalorder %s1059_s27, %s646_s24 }
  0x7a   : > { %p652_p7 = scmp.lt.u32.totalorder %s646_s24, %s225_s11 }
  0x7b   : > { %p651_p5 = por %p650_p3, %p649_p1 }
  0x7d   : > { %p653_p11 = por %p652_p7, %p651_p5 }
  0x7f   : > { %p654_p13 = pnand %p653_p11, %p647_p12 }
  0x81   : > { %657 = shalt.err (!%p654_p13)  }
  0x82   : > { %s658_s25 = scalar_lea.vmem %s1078_s9, 16  ;;  %p663_p2 = scmp.lt.s32.totalorder %s1078_s9, %s1034_s21 }
  0x83   : > { %p659_p0 = scmp.ne.s32.totalorder %s1078_s9, %s658_s25  ;;  %p664_p4 = scmp.lt.s32.totalorder %s1068_s10, %s658_s25 }
  0x85   : > { %p665_p6 = por %p664_p4, %p663_p2 }
  0x87   : > { %p666_p8 = pnand %p665_p6, %p659_p0 }
  0x89   : > { %669 = shalt.err (!%p666_p8)  }
  0x8a   : > { %237 = dma.hbm_to_vmem [thread:$0]  %s225_s11, 16, %s1078_s9, [#allocation3] }
  0x8b   : > { %s254_s26 = sadd.s32 4, %s1026_s18  ;;  %s883_s22 = smov [#allocation2 + $0x3]  }
  0x8c   : > { %s250_s2 = sshll.u32 %s883_s22, 4  ;;  %s255_s17 = sld [smem:[#allocation5 + %s254_s26]]  ;;  %s251_s2 = int_to_ptr.vmem [resolvable:$true] %s250_s2 }
  0x8d   : > { %s884_s13 = smov [#allocation2 + $0x4]   ;;  %s270_s16 = sadd.s32 5, %s1026_s18 }
  0x8e   : > { %s266_s3 = sshll.u32 %s884_s13, 4  ;;  %s471_s24 = sshll.u32 %s1095_s20, 4  ;;  %s1110_s3 = int_to_ptr.vmem [resolvable:$true] %s266_s3 }
  0x8f   : > { %s241_s25 = scalar_lea.hbm %s1223_s1, %s471_s24  ;;  %s1115_s4 = sld [smem:[#allocation5 + %s270_s16]] }
  0x90   : > { %s670_s7 = scalar_lea.hbm %s241_s25, 16  ;;  %p673_p10 = scmp.lt.u32.totalorder %s241_s25, %s1223_s1 }
  0x91   : > { %p671_p9 = scmp.ne.s32.totalorder %s241_s25, %s670_s7  ;;  %p674_p12 = scmp.lt.u32.totalorder %s1059_s27, %s670_s7 }
  0x92   : > { %p676_p3 = scmp.lt.u32.totalorder %s670_s7, %s241_s25 }
  0x93   : > { %p675_p1 = por %p674_p12, %p673_p10 }
  0x95   : > { %p677_p5 = por %p676_p3, %p675_p1 }
  0x97   : > { %p678_p7 = pnand %p677_p5, %p671_p9 }
  0x99   : > { %681 = shalt.err (!%p678_p7)  }
  0x9a   : > { %s682_s20 = scalar_lea.vmem %s251_s2, 16  ;;  %p687_p13 = scmp.lt.s32.totalorder %s251_s2, %s1034_s21 }
  0x9b   : > { %p683_p11 = scmp.ne.s32.totalorder %s251_s2, %s682_s20  ;;  %p688_p0 = scmp.lt.s32.totalorder %s1068_s10, %s682_s20 }
  0x9d   : > { %p689_p2 = por %p688_p0, %p687_p13 }
  0x9f   : > { %p690_p4 = pnand %p689_p2, %p683_p11 }
  0xa1   : > { %693 = shalt.err (!%p690_p4)  }
  0xa2   : > { %253 = dma.hbm_to_vmem [thread:$0]  %s241_s25, 16, %s251_s2, [#allocation3] }
  0xa3   : > { %s472_s26 = sshll.u32 %s255_s17, 4  ;;  %s885_s7 = smov [#allocation2 + $0x5]  }
  0xa4   : > { %s257_s16 = scalar_lea.hbm %s1223_s1, %s472_s26  ;;  %s282_s24 = sshll.u32 %s885_s7, 4  ;;  %s283_s24 = int_to_ptr.vmem [resolvable:$true] %s282_s24 }
  0xa5   : > { %s694_s23 = scalar_lea.hbm %s257_s16, 16  ;;  %p697_p8 = scmp.lt.u32.totalorder %s257_s16, %s1223_s1 }
  0xa6   : > { %p695_p6 = scmp.ne.s32.totalorder %s257_s16, %s694_s23  ;;  %p698_p9 = scmp.lt.u32.totalorder %s1059_s27, %s694_s23 }
  0xa7   : > { %p700_p12 = scmp.lt.u32.totalorder %s694_s23, %s257_s16 }
  0xa8   : > { %p699_p10 = por %p698_p9, %p697_p8 }
  0xaa   : > { %p701_p1 = por %p700_p12, %p699_p10 }
  0xac   : > { %p702_p3 = pnand %p701_p1, %p695_p6 }
  0xae   : > { %705 = shalt.err (!%p702_p3)  }
  0xaf   : > { %s706_s2 = scalar_lea.vmem %s1110_s3, 16  ;;  %p711_p7 = scmp.lt.s32.totalorder %s1110_s3, %s1034_s21 }
  0xb0   : > { %p707_p5 = scmp.ne.s32.totalorder %s1110_s3, %s706_s2  ;;  %p712_p11 = scmp.lt.s32.totalorder %s1068_s10, %s706_s2 }
  0xb2   : > { %p713_p13 = por %p712_p11, %p711_p7 }
  0xb4   : > { %p714_p0 = pnand %p713_p13, %p707_p5 }
  0xb6   : > { %717 = shalt.err (!%p714_p0)  }
  0xb7   : > { %269 = dma.hbm_to_vmem [thread:$0]  %s257_s16, 16, %s1110_s3, [#allocation3] }
  0xb8   : > { %s286_s17 = sadd.s32 6, %s1026_s18  ;;  %s473_s25 = sshll.u32 %s1115_s4, 4 }
  0xb9   : > { %s287_s11 = sld [smem:[#allocation5 + %s286_s17]]  ;;  %s273_s22 = scalar_lea.hbm %s1223_s1, %s473_s25 }
  0xba   : > { %s718_s13 = scalar_lea.hbm %s273_s22, 16  ;;  %p721_p4 = scmp.lt.u32.totalorder %s273_s22, %s1223_s1 }
  0xbb   : > { %p719_p2 = scmp.ne.s32.totalorder %s273_s22, %s718_s13  ;;  %p722_p6 = scmp.lt.u32.totalorder %s1059_s27, %s718_s13 }
  0xbc   : > { %p724_p9 = scmp.lt.u32.totalorder %s718_s13, %s273_s22 }
  0xbd   : > { %p723_p8 = por %p722_p6, %p721_p4 }
  0xbf   : > { %p725_p10 = por %p724_p9, %p723_p8 }
  0xc1   : > { %p726_p12 = pnand %p725_p10, %p719_p2 }
  0xc3   : > { %729 = shalt.err (!%p726_p12)  }
  0xc4   : > { %s730_s3 = scalar_lea.vmem %s283_s24, 16  ;;  %p735_p3 = scmp.lt.s32.totalorder %s283_s24, %s1034_s21 }
  0xc5   : > { %p731_p1 = scmp.ne.s32.totalorder %s283_s24, %s730_s3  ;;  %p736_p5 = scmp.lt.s32.totalorder %s1068_s10, %s730_s3 }
  0xc7   : > { %p737_p7 = por %p736_p5, %p735_p3 }
  0xc9   : > { %p738_p11 = pnand %p737_p7, %p731_p1 }
  0xcb   : > { %741 = shalt.err (!%p738_p11)  }
  0xcc   : > { %285 = dma.hbm_to_vmem [thread:$0]  %s273_s22, 16, %s283_s24, [#allocation3] }
  0xcd   : > { %s886_s4 = smov [#allocation2 + $0x6]   ;;  %s302_s0 = sadd.s32 7, %s1026_s18 }
  0xce   : > { %s298_s16 = sshll.u32 %s886_s4, 4  ;;  %s303_s9 = sld [smem:[#allocation5 + %s302_s0]]  ;;  %s299_s16 = int_to_ptr.vmem [resolvable:$true] %s298_s16 }
  0xcf   : > { %s474_s2 = sshll.u32 %s287_s11, 4  ;;  %s887_s17 = smov [#allocation2 + $0x7]  }
  0xd0   : > { %s314_s25 = sshll.u32 %s887_s17, 4  ;;  %s289_s13 = scalar_lea.hbm %s1223_s1, %s474_s2  ;;  %s315_s25 = int_to_ptr.vmem [resolvable:$true] %s314_s25 }
  0xd1   : > { %s742_s7 = scalar_lea.hbm %s289_s13, 16  ;;  %p745_p0 = scmp.lt.u32.totalorder %s289_s13, %s1223_s1 }
  0xd2   : > { %p743_p13 = scmp.ne.s32.totalorder %s289_s13, %s742_s7  ;;  %p746_p2 = scmp.lt.u32.totalorder %s1059_s27, %s742_s7 }
  0xd3   : > { %p748_p6 = scmp.lt.u32.totalorder %s742_s7, %s289_s13 }
  0xd4   : > { %p747_p4 = por %p746_p2, %p745_p0 }
  0xd6   : > { %p749_p8 = por %p748_p6, %p747_p4 }
  0xd8   : > { %p750_p9 = pnand %p749_p8, %p743_p13 }
  0xda   : > { %753 = shalt.err (!%p750_p9)  }
  0xdb   : > { %s754_s18 = scalar_lea.vmem %s299_s16, 16  ;;  %p759_p12 = scmp.lt.s32.totalorder %s299_s16, %s1034_s21 }
  0xdc   : > { %p755_p10 = scmp.ne.s32.totalorder %s299_s16, %s754_s18  ;;  %p760_p1 = scmp.lt.s32.totalorder %s1068_s10, %s754_s18 }
  0xde   : > { %p761_p3 = por %p760_p1, %p759_p12 }
  0xe0   : > { %p762_p5 = pnand %p761_p3, %p755_p10 }
  0xe2   : > { %765 = shalt.err (!%p762_p5)  }
  0xe3   : > { %301 = dma.hbm_to_vmem [thread:$0]  %s289_s13, 16, %s299_s16, [#allocation3] }
  0xe4   : > { %s475_s24 = sshll.u32 %s303_s9, 4 }
  0xe5   : > { %s305_s4 = scalar_lea.hbm %s1223_s1, %s475_s24 }
  0xe6   : > { %s766_s0 = scalar_lea.hbm %s305_s4, 16  ;;  %p769_p11 = scmp.lt.u32.totalorder %s305_s4, %s1223_s1 }
  0xe7   : > { %p767_p7 = scmp.ne.s32.totalorder %s305_s4, %s766_s0  ;;  %p770_p13 = scmp.lt.u32.totalorder %s1059_s27, %s766_s0 }
  0xe8   : > { %p772_p2 = scmp.lt.u32.totalorder %s766_s0, %s305_s4 }
  0xe9   : > { %p771_p0 = por %p770_p13, %p769_p11 }
  0xeb   : > { %p773_p4 = por %p772_p2, %p771_p0 }
  0xed   : > { %p774_p6 = pnand %p773_p4, %p767_p7 }
  0xef   : > { %777 = shalt.err (!%p774_p6)  }
  0xf0   : > { %s778_s16 = scalar_lea.vmem %s315_s25, 16  ;;  %p783_p9 = scmp.lt.s32.totalorder %s315_s25, %s1034_s21 }
  0xf1   : > { %p779_p8 = scmp.ne.s32.totalorder %s315_s25, %s778_s16  ;;  %p784_p10 = scmp.lt.s32.totalorder %s1068_s10, %s778_s16 }
  0xf3   : > { %p785_p12 = por %p784_p10, %p783_p9 }
  0xf5   : > { %p786_p1 = pnand %p785_p12, %p779_p8 }
  0xf7   : > { %789 = shalt.err (!%p786_p1)  }
  0xf8   : > { %317 = dma.hbm_to_vmem [thread:$0]  %s305_s4, 16, %s315_s25, [#allocation3] }
  0xf9   : > { %s188_s9 = scalar_lea.vmem [#allocation9], %s1030_s19 }
  0xfa   : > { %848 = dma.done.wait [#allocation3], 128 }
  0xfb   : > { %849 = vsyncadd [#allocation3], 4294967168  ;;  %v323_v2 = vld [vmem:[#allocation2] sm:$0xff]  ;;  %v324_v3 = vld [vmem:[#allocation6] sm:$0xff]  ;;  %s479_s19 = sshll.u32 %s868_s6, 7  ;;  %s368_s21 = sshll.u32 %s188_s9, 4  ;;  %s1175_s21 = int_to_ptr.vmem [resolvable:$true] %s368_s21 }
  0xfc   : > { %v325_v4 = vadd.f32 %v324_v3, %v323_v2  ;;  %s1173_s25 = scalar_lea.hbm %s1227_s5, %s479_s19  ;;  %s1250_s20 = sand.u32 1, %s860_s29  }
  0xfd   : > { %s354_s26 = scalar_lea.sflag [#allocation8], %s1250_s20  ;;  %s790_s13 = scalar_lea.vmem %s1175_s21, 128 }
  0xfe   : > { %326 = vadd.xlane.f32.xlu0 %v325_v4  ;;  %p791_p3 = scmp.ne.s32.totalorder %s1175_s21, %s790_s13  ;;  %p1251_p5 = scmp.ne.s32.totalorder %s1240_s12, 0 }
  0xff   : > { %s888_s6 = smov [#allocation9]  }
 0x100   : > { %p792_p7 = pnand %p791_p3, %p1251_p5  ;;  %s794_s7 = sshll.u32 %s888_s6, 4  ;;  %s795_s7 = int_to_ptr.vmem [resolvable:$false] %s794_s7 }
 0x101   : > { %s796_s23 = scalar_lea.vmem %s795_s7, 256  ;;  %p797_p13 = scmp.lt.s32.totalorder %s1175_s21, %s795_s7 }
 0x102   : > { %p793_p11 = pneg %p792_p7  ;;  %p798_p0 = scmp.lt.s32.totalorder %s796_s23, %s790_s13 }
 0x104   : > { %p799_p2 = por %p798_p0, %p797_p13 }
 0x106   : > { %p800_p4 = pnand %p799_p2, %p793_p11 }
 0x18b   : > { %v327_v5 = vpop.xlane.xlu0 %326 }
 0x18c   : > { %v329_v6 = vmul.f32 0.0078125, %v327_v5 }
 0x18e   : > { %v330_v7 = vsub.f32 %v325_v4, %v329_v6 }
 0x190   : > { %v331_v8 = vmul.f32 %v330_v7, %v330_v7 }
 0x192   : > { %332 = vadd.xlane.f32.xlu0 %v331_v8 }
 0x21f   : > { %v333_v9 = vpop.xlane.xlu0 %332 }
 0x220   : > { %v334_v10 = vmul.f32 0.0078125, %v333_v9 }
 0x222   : > { %v335_v11 = vadd.f32 1e-12, %v334_v10 }
 0x224   : > { %558 = vrsqrt.f32 %v335_v11 }
 0x22e   : > { %v559_v12 = vpop.eup %558 }
 0x22f   : > { %v337_v13 = vmul.f32 %v559_v12, %v330_v7 }
 0x231   : > { %v344_v14 = vmul.f32 %v1044_v0, %v337_v13 }
 0x233   : > { %v351_v15 = vadd.f32 %v1049_v1, %v344_v14 }
 0x235   : > { %352 = vst [vmem:[%s188_s9] sm:$0xff] %v351_v15 }
 0x236   : > { %803 = shalt.err (!%p800_p4)
}
 0x237   : > { %s804_s3 = scalar_lea.hbm %s1173_s25, 128  ;;  %s808_s11 = scalar_lea.hbm %s1227_s5, 256 }
 0x238   : > { %p805_p6 = scmp.ne.s32.totalorder %s1173_s25, %s804_s3  ;;  %p809_p10 = scmp.lt.u32.totalorder %s1173_s25, %s1227_s5 }
 0x239   : > { %p810_p12 = scmp.lt.u32.totalorder %s808_s11, %s804_s3  ;;  %p812_p3 = scmp.lt.u32.totalorder %s804_s3, %s1173_s25 }
 0x23a   : > { %p806_p8 = pnand %p805_p6, %p1251_p5 }
 0x23b   : > { %p811_p1 = por %p810_p12, %p809_p10 }
 0x23c   : > { %p807_p9 = pneg %p806_p8 }
 0x23d   : > { %p813_p7 = por %p812_p3, %p811_p1 }
 0x23f   : > { %p814_p11 = pnand %p813_p7, %p807_p9 }
 0x241   : > { %817 = shalt.err (!%p814_p11)
}
 0x242   : > { %487 = dma.vmem_to_hbm [thread:$0]  (%p1251_p5), %s1175_s21, 128, %s1173_s25, %s354_s26  }
 0x243 PF: > { %p499_p13 = scmp.ge.s32.totalorder %s876_s8, 2  ;;  %s380_s0 = sand.u32 1, %s856_s28  }
 0x244   : > { %p1252_p0 = scmp.ne.s32.totalorder %s1241_s14, 0  ;;  %s381_s2 = scalar_lea.sflag [#allocation8], %s380_s0 }
 0x246   : > { %p494_p2 = pnand %p499_p13, %p1252_p0 }
 0x248   : > { %851 = dma.done.wait (!%p494_p2), %s381_s2, 128  }
 0x249   : > { %853 = vsyncadd (!%p494_p2), %s381_s2, 4294967168  ;;  %s23_s8 = sadd.s32 1, %s876_s8   ;;  %s1253_s6 = sld [smem:[#allocation32_spill]] }
 0x24a   : > { %p20_p4 = scmp.ge.s32.totalorder %s23_s8, 4   ;;  %s1254_s7 = sld [smem:[#allocation33_spill]] }
 0x24b   : > { %s1255_s28 = smov %s860_s29  ;;  %s1256_s29 = smov %s864_s30 }
 0x24c   : > { %s1257_s30 = smov %s984_s15  ;;  %22 = sbr.rel (!%p20_p4) target bundleno = 18 (0x12), region = 117 }
 0x253   :  { %386 = vsyncpa [#allocation7], 1 }
 0x254   :  { %388 = vsyncpa [#allocation7 + $0x1], 1 }
 0x255   :  { %389 = vsyncpa [#allocation8], 1 }
 0x256   :  { %391 = vsyncpa [#allocation8 + $0x1], 1 }
 0x257   :  { %392 = vsyncmov [#allocation3] }
 0x25a   :  { %s393_s12 = vpop.sfrf %392 }
 0x25b   :  { %p482_p5 = scmp.ne.s32.totalorder %s393_s12, 0 }
 0x25d   :  { %397 = shalt.err (%p482_p5)  }

</bundles_post_ra>
